<compile_context>
chip_gen: v5e
topology: v5e:2x2
jax: 0.10.0
libtpu: 0.0.40
codegen_flags: <defaults>
</compile_context>

<pallas_src>
import jax
import jax.numpy as jnp
from jax.experimental import pallas as pl
from jax.experimental.pallas import tpu as pltpu

H1 = 64      # fc_state / fc_action output width
H2 = 32      # fc_q_val output width
HCAT = 2 * H1  # 128


def _round_up(n, m):
    return ((n + m - 1) // m) * m


def critic_kernel(z_ref, w1_ref, wq_ref, slab_ref, q_ref):
    """One batch tile of the fused Critic forward.

    z_ref    : [TB, num_states+num_actions]  concat'd inputs
    w1_ref   : [num_states+num_actions, 128] block-diagonal [[Ws^T,0],[0,Wa^T]]
    wq_ref   : [128, 32]                     fc_q_val weight (transposed)
    slab_ref : [4, 128]  row0=b1 (bs|ba), row1[:32]=bq, row2[:32]=wo, row3[0]=bo
    q_ref    : [TB, 1]
    """
    b1 = slab_ref[0:1, :]        # [1, 128]
    bq = slab_ref[1:2, 0:H2]     # [1, 32]
    wo = slab_ref[2:3, 0:H2]     # [1, 32]
    bo = slab_ref[3:4, 0:1]      # [1, 1]

    # h = relu(z @ W1 + b1)  ==  concat([relu(x@Ws^T+bs), relu(a@Wa^T+ba)])
    h = jnp.maximum(
        jnp.dot(z_ref[...], w1_ref[...], preferred_element_type=jnp.float32)
        + b1, 0.0)

    # h_q = relu(h @ Wq^T + bq)   (K=128 contraction, full MXU lane width)
    h_q = jnp.maximum(
        jnp.dot(h, wq_ref[...], preferred_element_type=jnp.float32)
        + bq, 0.0)

    # q = h_q @ wo^T + bo, done on VPU+XLU (N=1 would waste a full MXU pass)
    q_ref[...] = jnp.sum(h_q * wo, axis=-1, keepdims=True) + bo


def critic_forward(x, a, params, *, block_b=1024):
    """x: [B, num_states], a: [B, num_actions] -> q: [B, 1] (float32)."""
    (ws, bs), (wa, ba), (wq, bq), (wo, bo) = params
    B = x.shape[0]
    d_s = ws.shape[1]            # num_states
    d_a = wa.shape[1]            # num_actions
    d_in = d_s + d_a

    # --- weight / bias packing (glue, not hot path) -------------------------
    # Block-diagonal first-layer weight: [d_in, 128]
    w1 = jnp.zeros((d_in, HCAT), jnp.float32)
    w1 = w1.at[:d_s, :H1].set(ws.T.astype(jnp.float32))
    w1 = w1.at[d_s:, H1:].set(wa.T.astype(jnp.float32))

    wq_t = wq.T.astype(jnp.float32)              # [128, 32]

    # Bias / output-weight slab: [4, 128]
    slab = jnp.zeros((4, HCAT), jnp.float32)
    slab = slab.at[0, :H1].set(bs.astype(jnp.float32))
    slab = slab.at[0, H1:].set(ba.astype(jnp.float32))
    slab = slab.at[1, :H2].set(bq.astype(jnp.float32))
    slab = slab.at[2, :H2].set(wo.reshape(-1).astype(jnp.float32))
    slab = slab.at[3, 0].set(bo.reshape(-1)[0].astype(jnp.float32))

    # --- batch tiling -------------------------------------------------------
    TB = min(block_b, _round_up(B, 8))           # multiple of 8, capped
    B_pad = _round_up(B, TB)

    z = jnp.concatenate([x.astype(jnp.float32), a.astype(jnp.float32)], axis=1)
    if B_pad != B:
        z = jnp.pad(z, ((0, B_pad - B), (0, 0)))

    q = pl.pallas_call(
        critic_kernel,
        out_shape=jax.ShapeDtypeStruct((B_pad, 1), jnp.float32),
        grid=(B_pad // TB,),
        in_specs=[
            pl.BlockSpec((TB, d_in), lambda i: (i, 0)),        # z: tiled over batch
            pl.BlockSpec((d_in, HCAT), lambda i: (0, 0)),      # W1: resident
            pl.BlockSpec((HCAT, H2), lambda i: (0, 0)),        # Wq: resident
            pl.BlockSpec((4, HCAT), lambda i: (0, 0)),         # bias/wo slab: resident
        ],
        out_specs=pl.BlockSpec((TB, 1), lambda i: (i, 0)),
        compiler_params=pltpu.CompilerParams(
            dimension_semantics=("parallel",)),
    )(z, w1, wq_t, slab)

    return q[:B]


def init_linear(key, in_features, out_features):
    """Deterministic PyTorch-style Linear init: U(-1/sqrt(in), 1/sqrt(in))."""
    kw, kb = jax.random.split(key)
    bound = 1.0 / jnp.sqrt(jnp.float32(in_features))
    w = jax.random.uniform(kw, (out_features, in_features), jnp.float32,
                           minval=-bound, maxval=bound)
    b = jax.random.uniform(kb, (out_features,), jnp.float32,
                           minval=-bound, maxval=bound)
    return w, b


def reference_forward(x, a, params):
    (ws, bs), (wa, ba), (wq, bq), (wo, bo) = params
    h_state = jax.nn.relu(x @ ws.T + bs)
    h_act = jax.nn.relu(a @ wa.T + ba)
    h_concat = jnp.concatenate([h_state, h_act], axis=1)
    h_q = jax.nn.relu(h_concat @ wq.T + bq)
    return h_q @ wo.T + bo


if __name__ == "__main__":
    num_states, num_actions, batch = 16, 4, 8

    key = jax.random.PRNGKey(0)
    k_x, k_a, k1, k2, k3, k4 = jax.random.split(key, 6)

    x = jax.random.normal(k_x, (batch, num_states), jnp.float32)
    a = jax.random.normal(k_a, (batch, num_actions), jnp.float32)

    params = (
        init_linear(k1, num_states, 64),    # fc_state
        init_linear(k2, num_actions, 64),   # fc_action
        init_linear(k3, 128, 32),           # fc_q_val
        init_linear(k4, 32, 1),             # fc_q_out
    )

    q = critic_forward(x, a, params)
    q = jax.block_until_ready(q)

    q_ref = reference_forward(x, a, params)
    assert q.shape == (batch, 1)
    assert jnp.allclose(q, q_ref, atol=1e-5, rtol=1e-5), "mismatch vs reference"

    print("KERNEL_OK")
</pallas_src>

<mosaic_0001>
module attributes {stable_mosaic.version = 11 : i64} {
  func.func @critic_kernel(%arg0: i32, %arg1: memref<8x20xf32, #tpu.memory_space<vmem>>, %arg2: memref<20x128xf32, #tpu.memory_space<vmem>>, %arg3: memref<128x32xf32, #tpu.memory_space<vmem>>, %arg4: memref<4x128xf32, #tpu.memory_space<vmem>>, %arg5: memref<8x1xf32, #tpu.memory_space<vmem>>) attributes {dimension_semantics = [#tpu.dimension_semantics<parallel>], iteration_bounds = array<i64: 1>, scalar_prefetch = 0 : i64, scratch_operands = 0 : i64, tpu.core_type = #tpu.core_type<tc>, window_params = [{transform_indices = @transform_0, window_bounds = array<i64: 8, 20>}, {pipeline_mode = #tpu.pipeline_mode<synchronous>, transform_indices = @transform_1, window_bounds = array<i64: 20, 128>}, {pipeline_mode = #tpu.pipeline_mode<synchronous>, transform_indices = @transform_2, window_bounds = array<i64: 128, 32>}, {pipeline_mode = #tpu.pipeline_mode<synchronous>, transform_indices = @transform_3, window_bounds = array<i64: 4, 128>}, {transform_indices = @transform_4, window_bounds = array<i64: 8, 1>}]} {
    %c0 = arith.constant 0 : index
    %c0_0 = arith.constant 0 : index
    %0 = vector.load %arg4[%c0, %c0_0] : memref<4x128xf32, #tpu.memory_space<vmem>>, vector<1x128xf32>
    %c1 = arith.constant 1 : index
    %c0_1 = arith.constant 0 : index
    %1 = vector.load %arg4[%c1, %c0_1] : memref<4x128xf32, #tpu.memory_space<vmem>>, vector<1x32xf32>
    %c2 = arith.constant 2 : index
    %c0_2 = arith.constant 0 : index
    %2 = vector.load %arg4[%c2, %c0_2] : memref<4x128xf32, #tpu.memory_space<vmem>>, vector<1x32xf32>
    %c3 = arith.constant 3 : index
    %c0_3 = arith.constant 0 : index
    %3 = vector.load %arg4[%c3, %c0_3] : memref<4x128xf32, #tpu.memory_space<vmem>>, vector<1x1xf32>
    %c0_4 = arith.constant 0 : index
    %c0_5 = arith.constant 0 : index
    %4 = vector.load %arg1[%c0_4, %c0_5] : memref<8x20xf32, #tpu.memory_space<vmem>>, vector<8x20xf32>
    %c0_6 = arith.constant 0 : index
    %c0_7 = arith.constant 0 : index
    %5 = vector.load %arg2[%c0_6, %c0_7] : memref<20x128xf32, #tpu.memory_space<vmem>>, vector<20x128xf32>
    %cst = arith.constant dense<0.000000e+00> : vector<8x128xf32>
    %6 = tpu.matmul %4, %5, %cst {dimension_numbers = #tpu.dot_dimension_numbers<[1], [0], [0], [1], [0, 0, 1, 1], [], []>} : vector<8x20xf32>, vector<20x128xf32>, vector<8x128xf32> -> vector<8x128xf32>
    %7 = vector.broadcast %0 : vector<1x128xf32> to vector<8x128xf32>
    %8 = arith.addf %6, %7 : vector<8x128xf32>
    %cst_8 = arith.constant 0.000000e+00 : f32
    %9 = vector.broadcast %cst_8 : f32 to vector<8x128xf32>
    %10 = arith.maximumf %8, %9 : vector<8x128xf32>
    %c0_9 = arith.constant 0 : index
    %c0_10 = arith.constant 0 : index
    %11 = vector.load %arg3[%c0_9, %c0_10] : memref<128x32xf32, #tpu.memory_space<vmem>>, vector<128x32xf32>
    %cst_11 = arith.constant dense<0.000000e+00> : vector<8x32xf32>
    %12 = tpu.matmul %10, %11, %cst_11 {dimension_numbers = #tpu.dot_dimension_numbers<[1], [0], [0], [1], [0, 0, 1, 1], [], []>} : vector<8x128xf32>, vector<128x32xf32>, vector<8x32xf32> -> vector<8x32xf32>
    %13 = vector.broadcast %1 : vector<1x32xf32> to vector<8x32xf32>
    %14 = arith.addf %12, %13 : vector<8x32xf32>
    %cst_12 = arith.constant 0.000000e+00 : f32
    %15 = vector.broadcast %cst_12 : f32 to vector<8x32xf32>
    %16 = arith.maximumf %14, %15 : vector<8x32xf32>
    %17 = vector.broadcast %2 : vector<1x32xf32> to vector<8x32xf32>
    %18 = arith.mulf %16, %17 : vector<8x32xf32>
    %cst_13 = arith.constant dense<0.000000e+00> : vector<8xf32>
    %19 = vector.multi_reduction <add>, %18, %cst_13 [1] : vector<8x32xf32> to vector<8xf32>
    %20 = vector.shape_cast %19 : vector<8xf32> to vector<8x1xf32>
    %21 = vector.broadcast %3 : vector<1x1xf32> to vector<8x1xf32>
    %22 = arith.addf %20, %21 : vector<8x1xf32>
    %c0_14 = arith.constant 0 : index
    %c0_15 = arith.constant 0 : index
    %23 = vector.load %arg5[%c0_14, %c0_15] : memref<8x1xf32, #tpu.memory_space<vmem>>, vector<8x1xf32>
    tpu.vector_store %arg5[%c0_14, %c0_15], %22 {strides = array<i32>} : memref<8x1xf32, #tpu.memory_space<vmem>>, vector<8x1xf32>,
    return
  }
  func.func @transform_0(%arg0: i32) -> (i32, i32) {
    %c0_i32 = arith.constant 0 : i32
    %c0_i32_0 = arith.constant 0 : i32
    return %arg0, %c0_i32 : i32, i32
  }
  func.func @transform_1(%arg0: i32) -> (i32, i32) {
    %c0_i32 = arith.constant 0 : i32
    %c0_i32_0 = arith.constant 0 : i32
    %c0_i32_1 = arith.constant 0 : i32
    return %c0_i32, %c0_i32_0 : i32, i32
  }
  func.func @transform_2(%arg0: i32) -> (i32, i32) {
    %c0_i32 = arith.constant 0 : i32
    %c0_i32_0 = arith.constant 0 : i32
    %c0_i32_1 = arith.constant 0 : i32
    return %c0_i32, %c0_i32_0 : i32, i32
  }
  func.func @transform_3(%arg0: i32) -> (i32, i32) {
    %c0_i32 = arith.constant 0 : i32
    %c0_i32_0 = arith.constant 0 : i32
    %c0_i32_1 = arith.constant 0 : i32
    return %c0_i32, %c0_i32_0 : i32, i32
  }
  func.func @transform_4(%arg0: i32) -> (i32, i32) {
    %c0_i32 = arith.constant 0 : i32
    %c0_i32_0 = arith.constant 0 : i32
    return %arg0, %c0_i32 : i32, i32
  }
}

</mosaic_0001>

<bundles_post_ra>
// kernel: tpu_custom_call.1
= control target key start
LH: loop header
LB: loop body
LE: loop exit
PB: predicated region body
PF: predicated region fallthrough
CT: control target
= control target key end

     0   :  { %vm30_vm0 = vcmask 1043456   ;;  %vm26_vm1 = vcmask 162816   ;;  %vm95_vm2 = vcmask 261120   ;;  %vm101_vm3 = vcmask 7168   ;;  %s213_s1 = inlined_call_operand.vmem [shape: f32[20,128], index: 1, kind: input, shape index: {}]   ;;  %s214_s2 = inlined_call_operand.vmem [shape: f32[128,32], index: 2, kind: input, shape index: {}]   ;;  %s215_s0 = inlined_call_operand.vmem [shape: f32[8,20], index: 0, kind: input, shape index: {}]   ;;  %s216_s3 = inlined_call_operand.vmem [shape: f32[4,128], index: 3, kind: input, shape index: {}]   ;;  %s217_s4 = inlined_call_operand.vmem [shape: f32[8,1], index: 4, kind: output, shape index: {}]  }
   0x1   :  { %v24_v0 = vld [vmem:[%s213_s1 + $0x10] sm:$0xf]  ;;  %v23_v1 = vld [vmem:[%s213_s1 + $0x8] sm:$0xff]  ;;  %v70_v2 = vld [vmem:[%s214_s2 + $0x78] sm:$0xff] }
   0x2   :  { %107 = vmatpush.msk.msra.mxu0 %vm30_vm0, %v24_v0  ;;  %v69_v3 = vld [vmem:[%s214_s2 + $0x70] sm:$0xff]  ;;  %v22_v4 = vld [vmem:[%s213_s1] sm:$0xff]  ;;  %72 = vmatpush.msra.mxu1 %v70_v2  ;;  %v68_v6 = vld [vmem:[%s214_s2 + $0x68] sm:$0xff] }
   0x3   :  { %v21_v5 = vld [vmem:[%s215_s0] sm:$0xff]  ;;  %v66_v8 = vld [vmem:[%s214_s2 + $0x58] sm:$0xff]  ;;  %v65_v9 = vld [vmem:[%s214_s2 + $0x50] sm:$0xff] }
   0x4   :  { %48 = vmatpush.msra.mxu0 %v23_v1  ;;  %73 = vmatpush.msra.mxu1 %v69_v3  ;;  %v67_v7 = vld [vmem:[%s214_s2 + $0x60] sm:$0xff]  ;;  %v64_v10 = vld [vmem:[%s214_s2 + $0x48] sm:$0xff]  ;;  %v62_v12 = vld [vmem:[%s214_s2 + $0x38] sm:$0xff] }
   0x5   :  { %v63_v11 = vld [vmem:[%s214_s2 + $0x40] sm:$0xff]  ;;  %v61_v13 = vld [vmem:[%s214_s2 + $0x30] sm:$0xff]  ;;  %v60_v14 = vld [vmem:[%s214_s2 + $0x28] sm:$0xff] }
   0x6   :  { %49 = vmatpush.msra.mxu0 %v22_v4  ;;  %74 = vmatpush.msra.mxu1 %v68_v6  ;;  %v59_v15 = vld [vmem:[%s214_s2 + $0x20] sm:$0xff]  ;;  %v58_v16 = vld [vmem:[%s214_s2 + $0x18] sm:$0xff]  ;;  %v57_v17 = vld [vmem:[%s214_s2 + $0x10] sm:$0xff] }
   0x7   :  { %108 = vmatmul.msk.f32.vlgmr.msra.gmra.mxu0 %vm26_vm1, %v21_v5  ;;  %v56_v18 = vld [vmem:[%s214_s2 + $0x8] sm:$0xff]  ;;  %v55_v19 = vld [vmem:[%s214_s2] sm:$0xff] }
   0x8   :  { %75 = vmatpush.msra.mxu1 %v67_v7  ;;  %v109_v20 = vld [vmem:[%s216_s3] ss:$0 sm:$0xff]  ;;  %v110_v24 = vld [vmem:[%s216_s3 + $0x1] ss:$0 sm:$0xff]  ;;  %v111_v27 = vld [vmem:[%s216_s3 + $0x2] ss:$0 sm:$0xff] }
   0x9   :  { %v112_v31 = vld [vmem:[%s216_s3 + $0x3] ss:$0 sm:$0xff] }
   0xa   :  { %76 = vmatpush.msra.mxu1 %v66_v8 }
   0xc   :  { %77 = vmatpush.msra.mxu1 %v65_v9 }
   0xe   :  { %78 = vmatpush.msra.mxu1 %v64_v10 }
  0x10   :  { %79 = vmatpush.msra.mxu1 %v63_v11 }
  0x12   :  { %80 = vmatpush.msra.mxu1 %v62_v12 }
  0x14   :  { %81 = vmatpush.msra.mxu1 %v61_v13 }
  0x16   :  { %82 = vmatpush.msra.mxu1 %v60_v14 }
  0x18   :  { %83 = vmatpush.msra.mxu1 %v59_v15 }
  0x1a   :  { %84 = vmatpush.msra.mxu1 %v58_v16 }
  0x1c   :  { %85 = vmatpush.msra.mxu1 %v57_v17 }
  0x1e   :  { %86 = vmatpush.msra.mxu1 %v56_v18 }
  0x20   :  { %87 = vmatpush.msra.mxu1 %v55_v19 }
  0x84   :  { %v51_v21 = vpop.f32.mrf.mxu0 }
  0x85   :  { %v52_v22 = vadd.f32 %v109_v20, %v51_v21 }
  0x87   :  { %v54_v23 = vmax.f32 %v52_v22, 0.0 }
  0x89   :  { %88 = vmatmul.f32.vlgmr.msra.gmra.mxu1 %v54_v23 }
 0x106   :  { %v89_v25 = vpop.f32.mrf.mxu1 }
 0x107   :  { %v90_v26 = vadd.f32 %v110_v24, %v89_v25 }
 0x109   :  { %v92_v28 = vmax.f32 %v90_v26, 0.0 }
 0x10b   :  { %v94_v29 = vmul.f32 %v111_v27, %v92_v28 }
 0x10d   :  { %v96_v30 = vsel %vm95_vm2, %v94_v29, 0.0 }
 0x10e   :  { %97 = vadd.xlane.f32.xlu0 %v96_v30 }
 0x181   :  { %v98_v32 = vpop.xlane.xlu0 %97 }
 0x182   :  { %v100_v33 = vadd.f32 %v112_v31, %v98_v32 }
 0x184   :  { %102 = vst.msk [vmem:[%s217_s4] sm:$0xff] %vm101_vm3, %v100_v33 }

</bundles_post_ra>
